<compile_context>
chip_gen: v6e
topology: v6e:2x2x1
jax: 0.10.0
libtpu: 0.0.40
codegen_flags: <defaults>
</compile_context>

<pallas_src>
import numpy as np
import jax
import jax.numpy as jnp
from jax.experimental import pallas as pl
from jax.experimental.pallas import tpu as pltpu


_MXU_FC_THRESHOLD = 4096  # switch the tiny SE FCs to MXU dots above this C*Cr


# ---------------------------------------------------------------------------
# Hardware queries (generation-aware sizing, with conservative fallbacks)
# ---------------------------------------------------------------------------

def _vmem_capacity_bytes() -> int:
    try:
        cap = getattr(pltpu.get_tpu_info(), "vmem_capacity_bytes", None)
        if cap:
            return int(cap)
    except Exception:
        pass
    return 128 * 1024 * 1024  # v5e / v6e physical VMEM


def _device_kind() -> str:
    try:
        return jax.devices()[0].device_kind.lower()
    except Exception:
        return ""


def _num_tensorcores() -> int:
    kind = _device_kind()
    if "v7" in kind or "7x" in kind or "v4" in kind:
        return 2
    # v7x is also identifiable by its smaller (64 MiB) per-core VMEM.
    if _vmem_capacity_bytes() <= 64 * 1024 * 1024:
        return 2
    return 1


def _vmem_budgets():
    cap = _vmem_capacity_bytes()
    block_budget = int(cap * 0.40)                        # ~51 MiB / ~25 MiB
    vmem_limit = max(32 * 1024 * 1024, int(cap * 0.75))   # ~96 MiB / ~48 MiB
    return block_budget, vmem_limit


def _elementwise_dtype(x_dtype):
    """dtype for the full-size elementwise gating.  bf16 stays bf16 on chips
    with native bf16 VALUs (v6e/v7x); f32 on v5e and older generations."""
    if jnp.dtype(x_dtype) == jnp.float32:
        return jnp.float32
    kind = _device_kind()
    if any(t in kind for t in ("v2", "v3", "v4", "v5")):
        return jnp.float32
    return jnp.dtype(x_dtype)


# ---------------------------------------------------------------------------
# Block-size selection
# ---------------------------------------------------------------------------

def _pick_batch_block(n, bytes_per_image, budget, num_tc):
    """Largest batch block (a divisor of n) whose per-step footprint fits the
    VMEM budget.  Single-TC chips (v5e/v6e): fewest steps wins (grid=(1,) is
    fine).  Megacore (v7x): prefer an even step count, >= 2 per TensorCore
    when N allows it, so both cores get pipelined work."""
    cap = max(1, budget // max(1, bytes_per_image))
    fitting = [b for b in range(1, n + 1) if n % b == 0 and b <= cap] or [1]
    if num_tc <= 1:
        return max(fitting)
    steps = lambda b: n // b
    for pred in (lambda b: steps(b) % 2 == 0 and steps(b) >= 2 * num_tc,
                 lambda b: steps(b) % 2 == 0):
        ok = [b for b in fitting if pred(b)]
        if ok:
            return max(ok)
    return max(fitting)


def _pick_hw_tile(hw, c, itemsize, budget, max_hw_tile=None):
    """HW tile (multiple of 8, sublane axis) for the two-pass path.  The gate
    pass streams x in and out (both double-buffered) plus ~one transient."""
    per_row = c * (4 * itemsize + 4)
    cap = max(8, (budget // max(1, per_row)) // 8 * 8)
    hw8 = ((hw + 7) // 8) * 8
    tile = min(cap, hw8)
    if max_hw_tile is not None:
        tile = min(tile, max(8, (max_hw_tile // 8) * 8))
    return tile


# ---------------------------------------------------------------------------
# Kernels
# ---------------------------------------------------------------------------

def _make_single_pass_kernel(hw_true, channels_on_lanes, ew_dtype):
    inv_hw = np.float32(1.0 / hw_true)

    def kernel(x_ref, w1_ref, b1_ref, w2_ref, b2_ref, o_ref):
        if channels_on_lanes:
            # x: (B, HW, C) — C on lanes.  Sublane-reduce pool; FCs on the MXU
            # (this layout is chosen when C*Cr is large or HW % 128 != 0).
            pooled = jnp.sum(x_ref[...].astype(jnp.float32), axis=1) * inv_hw    # (B, C)
            z = jnp.dot(pooled, w1_ref[...], preferred_element_type=jnp.float32)  # (B, Cr)
            z = jnp.maximum(z + b1_ref[...], 0.0)
            gv = jnp.dot(z, w2_ref[...], preferred_element_type=jnp.float32)      # (B, C)
            gv = jax.nn.sigmoid(gv + b2_ref[...])
            g = gv[:, None, :]                                                    # (B, 1, C)
        else:
            # x: (B, C, HW) — C on sublanes, HW (multiple of 128) on lanes.
            # Lane-reduce pool; the tiny FCs stay on the VPU (C*Cr is small on
            # this path — big-C shapes are routed to the C-on-lanes layout).
            pooled = jnp.sum(x_ref[...].astype(jnp.float32), axis=2,
                             keepdims=True) * inv_hw                              # (B, C, 1)
            z = jnp.sum(pooled * w1_ref[...][None], axis=1, keepdims=True)        # (B, 1, Cr)
            z = jnp.maximum(z + b1_ref[...][None], 0.0)
            g = jnp.sum(w2_ref[...][None] * z, axis=2, keepdims=True)             # (B, C, 1)
            g = jax.nn.sigmoid(g + b2_ref[...][None])

        # Full-size elementwise gating in the chip-appropriate dtype; x_ref is
        # re-read here instead of keeping a live f32 copy of the whole block.
        o_ref[...] = (x_ref[...].astype(ew_dtype) * g.astype(ew_dtype)
                      ).astype(o_ref.dtype)

    return kernel


def _make_pool_fc_kernel(hw_true):
    """Two-pass path, pass 1: accumulate per-channel sums across HW tiles in
    the resident f32 output block; compute the gate at the final tile."""
    inv_hw = np.float32(1.0 / hw_true)

    def kernel(x_ref, w1_ref, b1_ref, w2_ref, b2_ref, g_ref):
        h = pl.program_id(1)

        @pl.when(h == 0)
        def _():
            g_ref[...] = jnp.zeros_like(g_ref)

        g_ref[...] += jnp.sum(x_ref[...].astype(jnp.float32), axis=1,
                              keepdims=True)                                  # (B, 1, C)

        @pl.when(h == pl.num_programs(1) - 1)
        def _():
            pooled = jnp.sum(g_ref[...], axis=1) * inv_hw                     # (B, C)
            z = jnp.dot(pooled, w1_ref[...], preferred_element_type=jnp.float32)
            z = jnp.maximum(z + b1_ref[...], 0.0)                             # (B, Cr)
            gv = jnp.dot(z, w2_ref[...], preferred_element_type=jnp.float32)
            gv = jax.nn.sigmoid(gv + b2_ref[...])                             # (B, C)
            g_ref[...] = gv[:, None, :]

    return kernel


def _make_apply_gate_kernel(ew_dtype):
    """Two-pass path, pass 2: stream x and apply the per-channel gate."""
    def kernel(x_ref, g_ref, o_ref):
        g = g_ref[...].astype(ew_dtype)                                       # (B, 1, C)
        o_ref[...] = (x_ref[...].astype(ew_dtype) * g).astype(o_ref.dtype)
    return kernel


# ---------------------------------------------------------------------------
# Wrapper
# ---------------------------------------------------------------------------

def _full_spec(shape):
    # Constant index map -> the (tiny) array stays resident across grid steps.
    return pl.BlockSpec(shape, lambda *_: (0,) * len(shape))


def cse_gate_pallas(x_nchw, params, *, mode="auto", max_hw_tile=None):
    """Channel squeeze-and-excitation gate (CSEModule of SEResNeXt).

    x_nchw: (N, C, H, W).  params = (w1, b1, w2, b2) in PyTorch 1x1-conv
    layouts: w1 (Cr, C), b1 (Cr,), w2 (C, Cr), b2 (C,).  Returns (N, C, H, W).
    mode: "auto" | "single" | "two_pass" (two_pass is the HW-tiled path).
    """
    N, C, H, W = x_nchw.shape
    HW = H * W
    w1, b1, w2, b2 = params
    Cr = w1.shape[0]
    itemsize = jnp.dtype(x_nchw.dtype).itemsize

    block_budget, vmem_limit = _vmem_budgets()
    num_tc = _num_tensorcores()
    ew_dtype = _elementwise_dtype(x_nchw.dtype)

    # Per-image single-pass footprint: x + out double-buffered + ~1 transient.
    bytes_per_image = C * HW * (4 * itemsize + 4)
    single_pass = bytes_per_image <= block_budget
    if mode == "single":
        single_pass = True
    elif mode == "two_pass":
        single_pass = False

    # Kernel-friendly weight layouts (tiny arrays; derived outside the kernel).
    w1_k = jnp.asarray(w1).T.astype(jnp.float32)                  # (C, Cr)
    b1_k = jnp.asarray(b1).reshape(1, Cr).astype(jnp.float32)     # (1, Cr)

    if single_pass:
        channels_on_lanes = (HW % 128 != 0) or (C * Cr > _MXU_FC_THRESHOLD)
        if channels_on_lanes:
            x_l = jnp.transpose(x_nchw, (0, 2, 3, 1)).reshape(N, HW, C)
            w2_k = jnp.asarray(w2).T.astype(jnp.float32)          # (Cr, C)
            b2_k = jnp.asarray(b2).reshape(1, C).astype(jnp.float32)
        else:
            x_l = x_nchw.reshape(N, C, HW)                        # pure reshape
            w2_k = jnp.asarray(w2).astype(jnp.float32)            # (C, Cr)
            b2_k = jnp.asarray(b2).reshape(C, 1).astype(jnp.float32)

        B = _pick_batch_block(N, bytes_per_image, block_budget, num_tc)
        grid = (N // B,)
        blk = (B,) + x_l.shape[1:]

        out = pl.pallas_call(
            _make_single_pass_kernel(HW, channels_on_lanes, ew_dtype),
            out_shape=jax.ShapeDtypeStruct(x_l.shape, x_l.dtype),
            grid_spec=pltpu.PrefetchScalarGridSpec(
                num_scalar_prefetch=0,
                grid=grid,
                in_specs=[
                    pl.BlockSpec(blk, lambda n: (n, 0, 0)),
                    _full_spec(w1_k.shape), _full_spec(b1_k.shape),
                    _full_spec(w2_k.shape), _full_spec(b2_k.shape),
                ],
                out_specs=pl.BlockSpec(blk, lambda n: (n, 0, 0)),
            ),
            compiler_params=pltpu.CompilerParams(
                dimension_semantics=("parallel",),
                vmem_limit_bytes=vmem_limit),
        )(x_l, w1_k, b1_k, w2_k, b2_k)

        if channels_on_lanes:
            return out.reshape(N, H, W, C).transpose(0, 3, 1, 2)
        return out.reshape(N, C, H, W)

    # -------------------- HW-tiled two-pass production path ------------------
    # Layout (N, HW, C): C on lanes (a multiple of 128 for real SEResNeXt
    # stages).  Zero padding of HW is harmless — the pooling divisor is the
    # true H*W and padded rows are sliced off after the gate pass.
    x_l = jnp.transpose(x_nchw, (0, 2, 3, 1)).reshape(N, HW, C)
    w2_k = jnp.asarray(w2).T.astype(jnp.float32)                  # (Cr, C)
    b2_k = jnp.asarray(b2).reshape(1, C).astype(jnp.float32)

    hw_tile = _pick_hw_tile(HW, C, itemsize, block_budget, max_hw_tile)
    n_hw = -(-HW // hw_tile)
    HW_pad = n_hw * hw_tile
    if HW_pad != HW:
        x_l = jnp.pad(x_l, ((0, 0), (0, HW_pad - HW), (0, 0)))

    # Pass 1: pooled channel means -> gate vector g of shape (N, 1, C), f32.
    gate = pl.pallas_call(
        _make_pool_fc_kernel(HW),
        out_shape=jax.ShapeDtypeStruct((N, 1, C), jnp.float32),
        grid_spec=pltpu.PrefetchScalarGridSpec(
            num_scalar_prefetch=0,
            grid=(N, n_hw),
            in_specs=[
                pl.BlockSpec((1, hw_tile, C), lambda n, h: (n, h, 0)),
                _full_spec(w1_k.shape), _full_spec(b1_k.shape),
                _full_spec(w2_k.shape), _full_spec(b2_k.shape),
            ],
            out_specs=pl.BlockSpec((1, 1, C), lambda n, h: (n, 0, 0)),
        ),
        compiler_params=pltpu.CompilerParams(
            dimension_semantics=("parallel", "arbitrary"),
            vmem_limit_bytes=vmem_limit),
    )(x_l, w1_k, b1_k, w2_k, b2_k)

    # Pass 2: stream x again and apply the per-channel gate.
    out = pl.pallas_call(
        _make_apply_gate_kernel(ew_dtype),
        out_shape=jax.ShapeDtypeStruct((N, HW_pad, C), x_l.dtype),
        grid_spec=pltpu.PrefetchScalarGridSpec(
            num_scalar_prefetch=0,
            grid=(N, n_hw),
            in_specs=[
                pl.BlockSpec((1, hw_tile, C), lambda n, h: (n, h, 0)),
                pl.BlockSpec((1, 1, C), lambda n, h: (n, 0, 0)),
            ],
            out_specs=pl.BlockSpec((1, hw_tile, C), lambda n, h: (n, h, 0)),
        ),
        compiler_params=pltpu.CompilerParams(
            dimension_semantics=("parallel", "parallel"),
            vmem_limit_bytes=vmem_limit),
    )(x_l, gate)

    return out[:, :HW, :].reshape(N, H, W, C).transpose(0, 3, 1, 2)


# ---------------------------------------------------------------------------
# Pure-JAX reference (matches CSEModule.forward) and self-test
# ---------------------------------------------------------------------------

def cse_gate_reference(x_nchw, params):
    w1, b1, w2, b2 = params
    xf = x_nchw.astype(jnp.float32)
    pooled = jnp.mean(xf, axis=(2, 3))                                   # (N, C)
    z = jnp.maximum(
        jnp.dot(pooled, w1.T, precision=jax.lax.Precision.HIGHEST) + b1, 0.0)
    g = jax.nn.sigmoid(
        jnp.dot(z, w2.T, precision=jax.lax.Precision.HIGHEST) + b2)      # (N, C)
    return (xf * g[:, :, None, None]).astype(x_nchw.dtype)


if __name__ == "__main__":
    # Small shapes consistent with the module: N=2, C=32, reduction=4.
    N, C, H, W = 2, 32, 16, 16
    reduction = 4
    Cr = C // reduction

    key = jax.random.PRNGKey(0)
    kx, k1, k2, k3, k4, kx2 = jax.random.split(key, 6)

    # PyTorch-layout 1x1-conv parameters of the SE block.
    w1 = jax.random.normal(k1, (Cr, C), dtype=jnp.float32) * 0.1   # C -> Cr
    b1 = jax.random.normal(k2, (Cr,), dtype=jnp.float32) * 0.1
    w2 = jax.random.normal(k3, (C, Cr), dtype=jnp.float32) * 0.1   # Cr -> C
    b2 = jax.random.normal(k4, (C,), dtype=jnp.float32) * 0.1
    params = (w1, b1, w2, b2)

    # 1) 16x16 images: HW=256 is a multiple of 128 -> transpose-free
    #    channels-on-sublanes single-pass path (lane-dense stores, VPU FCs).
    x1 = jax.random.normal(kx, (N, C, H, W), dtype=jnp.float32)
    out1 = jax.block_until_ready(cse_gate_pallas(x1, params))
    ref1 = jax.block_until_ready(cse_gate_reference(x1, params))
    np.testing.assert_allclose(np.asarray(out1), np.asarray(ref1),
                               rtol=1e-4, atol=1e-5)

    # 2) 14x14 images: HW=196 is NOT a multiple of 128 -> channels-on-lanes
    #    single-pass path with the FCs on the MXU (tolerance allows for MXU
    #    f32 rounding in the tiny FC dots).
    x2 = jax.random.normal(kx2, (N, C, 14, 14), dtype=jnp.float32)
    out2 = jax.block_until_ready(cse_gate_pallas(x2, params))
    ref2 = jax.block_until_ready(cse_gate_reference(x2, params))
    np.testing.assert_allclose(np.asarray(out2), np.asarray(ref2),
                               rtol=1e-3, atol=1e-3)

    # 3) Same input forced through the HW-tiled two-pass (pool + gate) path
    #    that production SEResNeXt tail shapes require; a small tile exercises
    #    the cross-tile accumulation and the HW zero-padding/slicing.
    out3 = jax.block_until_ready(
        cse_gate_pallas(x2, params, mode="two_pass", max_hw_tile=64))
    np.testing.assert_allclose(np.asarray(out3), np.asarray(ref2),
                               rtol=1e-3, atol=1e-3)

    print("KERNEL_OK")
</pallas_src>

<mosaic_0001>
module attributes {stable_mosaic.version = 11 : i64} {
  func.func @kernel(%arg0: i32, %arg1: memref<2x32x256xf32, #tpu.memory_space<vmem>>, %arg2: memref<32x8xf32, #tpu.memory_space<vmem>>, %arg3: memref<1x8xf32, #tpu.memory_space<vmem>>, %arg4: memref<32x8xf32, #tpu.memory_space<vmem>>, %arg5: memref<32x1xf32, #tpu.memory_space<vmem>>, %arg6: memref<2x32x256xf32, #tpu.memory_space<vmem>>) attributes {dimension_semantics = [#tpu.dimension_semantics<parallel>], iteration_bounds = array<i64: 1>, scalar_prefetch = 0 : i64, scratch_operands = 0 : i64, tpu.core_type = #tpu.core_type<tc>, window_params = [{transform_indices = @transform_0, window_bounds = array<i64: 2, 32, 256>}, {pipeline_mode = #tpu.pipeline_mode<synchronous>, transform_indices = @transform_1, window_bounds = array<i64: 32, 8>}, {pipeline_mode = #tpu.pipeline_mode<synchronous>, transform_indices = @transform_2, window_bounds = array<i64: 1, 8>}, {pipeline_mode = #tpu.pipeline_mode<synchronous>, transform_indices = @transform_3, window_bounds = array<i64: 32, 8>}, {pipeline_mode = #tpu.pipeline_mode<synchronous>, transform_indices = @transform_4, window_bounds = array<i64: 32, 1>}, {transform_indices = @transform_5, window_bounds = array<i64: 2, 32, 256>}]} {
    %c0 = arith.constant 0 : index
    %c0_0 = arith.constant 0 : index
    %c0_1 = arith.constant 0 : index
    %0 = vector.load %arg1[%c0, %c0_0, %c0_1] : memref<2x32x256xf32, #tpu.memory_space<vmem>>, vector<2x32x256xf32>
    %cst = arith.constant dense<0.000000e+00> : vector<2x32xf32>
    %1 = vector.multi_reduction <add>, %0, %cst [2] : vector<2x32x256xf32> to vector<2x32xf32>
    %2 = vector.shape_cast %1 : vector<2x32xf32> to vector<2x32x1xf32>
    %cst_2 = arith.constant 3.906250e-03 : f32
    %3 = vector.broadcast %cst_2 : f32 to vector<2x32x1xf32>
    %4 = arith.mulf %2, %3 : vector<2x32x1xf32>
    %c0_3 = arith.constant 0 : index
    %c0_4 = arith.constant 0 : index
    %5 = vector.load %arg2[%c0_3, %c0_4] : memref<32x8xf32, #tpu.memory_space<vmem>>, vector<32x8xf32>
    %6 = vector.shape_cast %5 : vector<32x8xf32> to vector<1x32x8xf32>
    %7 = vector.broadcast %4 : vector<2x32x1xf32> to vector<2x32x8xf32>
    %8 = vector.broadcast %6 : vector<1x32x8xf32> to vector<2x32x8xf32>
    %9 = arith.mulf %7, %8 : vector<2x32x8xf32>
    %cst_5 = arith.constant dense<0.000000e+00> : vector<2x8xf32>
    %10 = vector.multi_reduction <add>, %9, %cst_5 [1] : vector<2x32x8xf32> to vector<2x8xf32>
    %11 = vector.shape_cast %10 : vector<2x8xf32> to vector<2x1x8xf32>
    %c0_6 = arith.constant 0 : index
    %c0_7 = arith.constant 0 : index
    %12 = vector.load %arg3[%c0_6, %c0_7] : memref<1x8xf32, #tpu.memory_space<vmem>>, vector<1x8xf32>
    %13 = vector.shape_cast %12 : vector<1x8xf32> to vector<1x1x8xf32>
    %14 = vector.broadcast %13 : vector<1x1x8xf32> to vector<2x1x8xf32>
    %15 = arith.addf %11, %14 : vector<2x1x8xf32>
    %cst_8 = arith.constant 0.000000e+00 : f32
    %16 = vector.broadcast %cst_8 : f32 to vector<2x1x8xf32>
    %17 = arith.maximumf %15, %16 : vector<2x1x8xf32>
    %c0_9 = arith.constant 0 : index
    %c0_10 = arith.constant 0 : index
    %18 = vector.load %arg4[%c0_9, %c0_10] : memref<32x8xf32, #tpu.memory_space<vmem>>, vector<32x8xf32>
    %19 = vector.shape_cast %18 : vector<32x8xf32> to vector<1x32x8xf32>
    %20 = vector.broadcast %19 : vector<1x32x8xf32> to vector<2x32x8xf32>
    %21 = vector.broadcast %17 : vector<2x1x8xf32> to vector<2x32x8xf32>
    %22 = arith.mulf %20, %21 : vector<2x32x8xf32>
    %cst_11 = arith.constant dense<0.000000e+00> : vector<2x32xf32>
    %23 = vector.multi_reduction <add>, %22, %cst_11 [2] : vector<2x32x8xf32> to vector<2x32xf32>
    %24 = vector.shape_cast %23 : vector<2x32xf32> to vector<2x32x1xf32>
    %c0_12 = arith.constant 0 : index
    %c0_13 = arith.constant 0 : index
    %25 = vector.load %arg5[%c0_12, %c0_13] : memref<32x1xf32, #tpu.memory_space<vmem>>, vector<32x1xf32>
    %26 = vector.shape_cast %25 : vector<32x1xf32> to vector<1x32x1xf32>
    %27 = vector.broadcast %26 : vector<1x32x1xf32> to vector<2x32x1xf32>
    %28 = arith.addf %24, %27 : vector<2x32x1xf32>
    %29 = arith.negf %28 : vector<2x32x1xf32>
    %30 = math.exp %29 : vector<2x32x1xf32>
    %cst_14 = arith.constant 1.000000e+00 : f32
    %31 = vector.broadcast %cst_14 : f32 to vector<2x32x1xf32>
    %32 = arith.addf %31, %30 : vector<2x32x1xf32>
    %33 = arith.divf %31, %32 : vector<2x32x1xf32>
    %c0_15 = arith.constant 0 : index
    %c0_16 = arith.constant 0 : index
    %c0_17 = arith.constant 0 : index
    %34 = vector.load %arg1[%c0_15, %c0_16, %c0_17] : memref<2x32x256xf32, #tpu.memory_space<vmem>>, vector<2x32x256xf32>
    %35 = vector.broadcast %33 : vector<2x32x1xf32> to vector<2x32x256xf32>
    %36 = arith.mulf %34, %35 : vector<2x32x256xf32>
    %c0_18 = arith.constant 0 : index
    %c0_19 = arith.constant 0 : index
    %c0_20 = arith.constant 0 : index
    %37 = vector.load %arg6[%c0_18, %c0_19, %c0_20] : memref<2x32x256xf32, #tpu.memory_space<vmem>>, vector<2x32x256xf32>
    tpu.vector_store %arg6[%c0_18, %c0_19, %c0_20], %36 {strides = array<i32>} : memref<2x32x256xf32, #tpu.memory_space<vmem>>, vector<2x32x256xf32>,
    return
  }
  func.func @transform_0(%arg0: i32) -> (i32, i32, i32) {
    %c0_i32 = arith.constant 0 : i32
    %c0_i32_0 = arith.constant 0 : i32
    %c0_i32_1 = arith.constant 0 : i32
    return %arg0, %c0_i32, %c0_i32_0 : i32, i32, i32
  }
  func.func @transform_1(%arg0: i32) -> (i32, i32) {
    %c0_i32 = arith.constant 0 : i32
    %c0_i32_0 = arith.constant 0 : i32
    %c0_i32_1 = arith.constant 0 : i32
    return %c0_i32, %c0_i32_0 : i32, i32
  }
  func.func @transform_2(%arg0: i32) -> (i32, i32) {
    %c0_i32 = arith.constant 0 : i32
    %c0_i32_0 = arith.constant 0 : i32
    %c0_i32_1 = arith.constant 0 : i32
    return %c0_i32, %c0_i32_0 : i32, i32
  }
  func.func @transform_3(%arg0: i32) -> (i32, i32) {
    %c0_i32 = arith.constant 0 : i32
    %c0_i32_0 = arith.constant 0 : i32
    %c0_i32_1 = arith.constant 0 : i32
    return %c0_i32, %c0_i32_0 : i32, i32
  }
  func.func @transform_4(%arg0: i32) -> (i32, i32) {
    %c0_i32 = arith.constant 0 : i32
    %c0_i32_0 = arith.constant 0 : i32
    %c0_i32_1 = arith.constant 0 : i32
    return %c0_i32, %c0_i32_0 : i32, i32
  }
  func.func @transform_5(%arg0: i32) -> (i32, i32, i32) {
    %c0_i32 = arith.constant 0 : i32
    %c0_i32_0 = arith.constant 0 : i32
    %c0_i32_1 = arith.constant 0 : i32
    return %arg0, %c0_i32, %c0_i32_0 : i32, i32, i32
  }
}

</mosaic_0001>

<bundles_post_ra>
// kernel: tpu_custom_call.1
= control target key start
LH: loop header
LB: loop body
LE: loop exit
PB: predicated region body
PF: predicated region fallthrough
CT: control target
= control target key end

     0   :  { %10 = vsyncpa [#allocation3], 0  ;;  %s577_s0 = inlined_call_operand.hbm [shape: f32[2,32,256], index: 0, kind: input, shape index: {}]   ;;  %s578_s1 = inlined_call_operand.vmem [shape: f32[32,8], index: 1, kind: input, shape index: {}]   ;;  %s579_s2 = inlined_call_operand.vmem [shape: f32[1,8], index: 2, kind: input, shape index: {}]   ;;  %s580_s3 = inlined_call_operand.vmem [shape: f32[32,8], index: 3, kind: input, shape index: {}]   ;;  %s581_s4 = inlined_call_operand.vmem [shape: f32[32,1], index: 4, kind: input, shape index: {}]   ;;  %s582_s5 = inlined_call_operand.hbm [shape: f32[2,32,256], index: 5, kind: output, shape index: {}]  }
   0x1   :  { %11 = vsyncpa [#allocation4], 0  ;;  %s411_s18 = smov [#allocation2]  }
   0x2   :  { %s17_s19 = sshll.u32 %s411_s18, 4  ;;  %s18_s19 = int_to_ptr.vmem [resolvable:$true] %s17_s19 }
   0x3   :  { %s375_s20 = scalar_lea.vmem %s18_s19, 2048  ;;  %p380_p1 = scmp.lt.s32.totalorder %s18_s19, %s18_s19 }
   0x4   :  { %p376_p0 = scmp.ne.s32.totalorder %s18_s19, %s375_s20  ;;  %p381_p2 = scmp.lt.s32.totalorder %s375_s20, %s375_s20 }
   0x6   :  { %p382_p3 = por %p381_p2, %p380_p1 }
   0x8   :  { %p383_p4 = pnand %p382_p3, %p376_p0 }
   0xa   :  { %386 = shalt.err (!%p383_p4)
}
   0xb   :  { %s412_s21 = smov 256   ;;  %s413_s22 = smov 16  }
   0xc   :  { %23 = dma.hbm_to_vmem [thread:$0]  %s577_s0, 2048, %s18_s19, [#allocation3], %s412_s21, %s412_s21, %s413_s22  }
   0xd   :  { %407 = dma.done.wait [#allocation3], 2048  }
   0xe   :  { %408 = vsyncadd [#allocation3], 4294965248  ;;  %v452_v0 = vld [vmem:[#allocation2 + $0x40] sm:$0xff]  ;;  %v454_v1 = vld [vmem:[#allocation2 + $0x48] sm:$0xff]  ;;  %vm95_vm0 = vcmask 64512  }
   0xf   :  { %v456_v2 = vld [vmem:[#allocation2] sm:$0xff]  ;;  %v63_v3 = vadd.f32 %v454_v1, %v452_v0  ;;  %v460_v4 = vld [vmem:[#allocation2 + $0x8] sm:$0xff]  ;;  %v462_v5 = vld [vmem:[#allocation2 + $0x50] sm:$0xff] }
  0x10   :  { %v464_v6 = vld [vmem:[#allocation2 + $0x58] sm:$0xff]  ;;  %v51_v7 = vadd.f32 %v460_v4, %v456_v2  ;;  %v468_v8 = vld [vmem:[#allocation2 + $0x10] sm:$0xff]  ;;  %v476_v12 = vld [vmem:[#allocation2 + $0x60] sm:$0xff] }
  0x11   :  { %v470_v9 = vld [vmem:[#allocation2 + $0x18] sm:$0xff]  ;;  %64 = vadd.xlane.f32.xlu1 %v63_v3  ;;  %v66_v10 = vadd.f32 %v464_v6, %v462_v5  ;;  %v478_v13 = vld [vmem:[#allocation2 + $0x68] sm:$0xff]  ;;  %v480_v14 = vld [vmem:[#allocation2 + $0x20] sm:$0xff] }
  0x12   :  { %52 = vadd.xlane.f32.xlu0 %v51_v7  ;;  %v54_v11 = vadd.f32 %v470_v9, %v468_v8  ;;  %v482_v15 = vld [vmem:[#allocation2 + $0x28] sm:$0xff]  ;;  %v69_v16 = vadd.f32 %v478_v13, %v476_v12  ;;  %v488_v18 = vld [vmem:[#allocation2 + $0x70] sm:$0xff]  ;;  %v490_v19 = vld [vmem:[#allocation2 + $0x78] sm:$0xff] }
  0x13   :  { %v57_v17 = vadd.f32 %v482_v15, %v480_v14  ;;  %v492_v20 = vld [vmem:[#allocation2 + $0x30] sm:$0xff]  ;;  %v494_v21 = vld [vmem:[#allocation2 + $0x38] sm:$0xff]  ;;  %v72_v22 = vadd.f32 %v490_v19, %v488_v18  ;;  %v83_v27 = vld [vmem:[%s578_s1] sm:$0xff] }
  0x14   :  { %v60_v23 = vadd.f32 %v494_v21, %v492_v20  ;;  %v84_v30 = vld [vmem:[%s578_s1 + $0x8] sm:$0xff]  ;;  %v85_v40 = vld [vmem:[%s578_s1 + $0x10] sm:$0xff]  ;;  %v86_v49 = vld [vmem:[%s578_s1 + $0x18] sm:$0xff] }
  0x15   :  { %67 = vadd.xlane.f32.xlu1 %v66_v10 }
  0x16   :  { %55 = vadd.xlane.f32.xlu0 %v54_v11 }
  0x19   :  { %70 = vadd.xlane.f32.xlu1 %v69_v16 }
  0x1a   :  { %58 = vadd.xlane.f32.xlu0 %v57_v17 }
  0x1d   :  { %73 = vadd.xlane.f32.xlu1 %v72_v22 }
  0x1e   :  { %61 = vadd.xlane.f32.xlu0 %v60_v23 }
  0x9a   :  { %v65_v24 = vpop.xlane.xlu1 %64 }
  0x9b   :  { %v79_v25 = vmul.f32 0.00390625, %v65_v24  ;;  %v53_v26 = vpop.xlane.xlu0 %52  ;;  %v131_v24 = vlaneseq }
  0x9c   :  { %v75_v33 = vmul.f32 0.00390625, %v53_v26 }
  0x9d   :  { %v91_v28 = vmul.f32 %v83_v27, %v79_v25 }
  0x9e   :  { %v68_v29 = vpop.xlane.xlu1 %67  ;;  %v87_v43 = vmul.f32 %v83_v27, %v75_v33 }
  0x9f   :  { %v80_v31 = vmul.f32 0.00390625, %v68_v29  ;;  %v56_v32 = vpop.xlane.xlu0 %55  ;;  %v109_v35 = vsel %vm95_vm0, %v91_v28, 0.0  ;;  %v122_v29 = vld [vmem:[%s579_s2] sm:$0x1] }
  0xa0   :  { %v76_v34 = vmul.f32 0.00390625, %v56_v32  ;;  %v96_v54 = vsel %vm95_vm0, %v87_v43, 0.0 }
  0xa1   :  { %v92_v36 = vmul.f32 %v84_v30, %v80_v31 }
  0xa2   :  { %v88_v37 = vmul.f32 %v84_v30, %v76_v34  ;;  %v71_v38 = vpop.xlane.xlu1 %70  ;;  %v132_v30 = vshrl.u32 %v131_v24, 7 }
  0xa3   :  { %v110_v39 = vsel %vm95_vm0, %v92_v36, 0.0  ;;  %v81_v41 = vmul.f32 0.00390625, %v71_v38  ;;  %v59_v42 = vpop.xlane.xlu0 %58  ;;  %v127_v38 = vld [vmem:[%s580_s3] sm:$0xff] }
  0xa4   :  { %v111_v44 = vadd.f32 %v110_v39, %v109_v35  ;;  %v77_v45 = vmul.f32 0.00390625, %v59_v42  ;;  %v97_v47 = vsel %vm95_vm0, %v88_v37, 0.0  ;;  %v133_v35 = vsub.s32 0, %v132_v30  ;;  %v128_v37 = vld [vmem:[%s580_s3 + $0x8] sm:$0xff]  ;;  %v129_v42 = vld [vmem:[%s580_s3 + $0x10] sm:$0xff] }
  0xa5   :  { %v93_v46 = vmul.f32 %v85_v40, %v81_v41  ;;  %v98_v58 = vadd.f32 %v97_v47, %v96_v54  ;;  %v130_v41 = vld [vmem:[%s580_s3 + $0x18] sm:$0xff] }
  0xa6   :  { %v89_v48 = vmul.f32 %v85_v40, %v77_v45  ;;  %v74_v50 = vpop.xlane.xlu1 %73 }
  0xa7   :  { %v112_v51 = vsel %vm95_vm0, %v93_v46, 0.0  ;;  %v82_v52 = vmul.f32 0.00390625, %v74_v50  ;;  %v62_v53 = vpop.xlane.xlu0 %61 }
  0xa8   :  { %v113_v55 = vadd.f32 %v112_v51, %v111_v44  ;;  %v99_v56 = vsel %vm95_vm0, %v89_v48, 0.0  ;;  %v78_v57 = vmul.f32 0.00390625, %v62_v53 }
  0xa9   :  { %v94_v59 = vmul.f32 %v86_v49, %v82_v52  ;;  %v100_v61 = vadd.f32 %v99_v56, %v98_v58 }
  0xaa   :  { %v90_v60 = vmul.f32 %v86_v49, %v78_v57 }
  0xab   :  { %v114_v62 = vsel %vm95_vm0, %v94_v59, 0.0 }
  0xac   :  { %v115_v63 = vadd.f32 %v114_v62, %v113_v55  ;;  %v101_v3 = vsel %vm95_vm0, %v90_v60, 0.0  ;;  %v414_v60 = vmov 0   ;;  %v171_v62 = vld [vmem:[%s581_s4] sm:$0xff] }
  0xad   :  { %v102_v7 = vadd.f32 %v101_v3, %v100_v61  ;;  %334 = vset.pattern.permute.xlu1 %v414_v60  ;;  %333 = vset.pattern.permute.xlu0 %v414_v60  ;;  %v172_v61 = vld [vmem:[%s581_s4 + $0x8] sm:$0xff] }
  0xae   :  { %v116_v10 = vrot.slane %v115_v63, 4 }
  0xaf   :  { %v103_v11 = vrot.slane %v102_v7, 4 }
  0xb0   :  { %v117_v16 = vadd.f32 %v116_v10, %v115_v63 }
  0xb1   :  { %v104_v17 = vadd.f32 %v103_v11, %v102_v7  ;;  %v174_v11 = vld [vmem:[%s581_s4 + $0x18] sm:$0xff] }
  0xb2   :  { %v118_v22 = vrot.slane %v117_v16, 2 }
  0xb3   :  { %v105_v23 = vrot.slane %v104_v17, 2 }
  0xb4   :  { %v119_v25 = vadd.f32 %v118_v22, %v117_v16  ;;  %v173_v16 = vld [vmem:[%s581_s4 + $0x10] sm:$0xff]  ;;  %s415_s4 = smov [#allocation5]  }
  0xb5   :  { %v106_v26 = vadd.f32 %v105_v23, %v104_v17  ;;  %s308_s24 = sshll.u32 %s415_s4, 4  ;;  %s309_s24 = int_to_ptr.vmem [resolvable:$true] %s308_s24 }
  0xb6   :  { %v120_v27 = vrot.slane %v119_v25, 1  ;;  %s387_s0 = scalar_lea.vmem %s309_s24, 2048  ;;  %p392_p6 = scmp.lt.s32.totalorder %s309_s24, %s309_s24 }
  0xb7   :  { %v107_v28 = vrot.slane %v106_v26, 1  ;;  %p388_p5 = scmp.ne.s32.totalorder %s309_s24, %s387_s0  ;;  %p393_p7 = scmp.lt.s32.totalorder %s387_s0, %s387_s0 }
  0xb8   :  { %v121_v31 = vadd.f32 %v120_v27, %v119_v25 }
  0xb9   :  { %v108_v32 = vadd.f32 %v107_v28, %v106_v26  ;;  %p394_p8 = por %p393_p7, %p392_p6 }
  0xba   :  { %v124_v33 = vadd.f32 %v122_v29, %v121_v31 }
  0xbb   :  { %v123_v34 = vadd.f32 %v122_v29, %v108_v32  ;;  %p395_p9 = pnand %p394_p8, %p388_p5 }
  0xbc   :  { %v126_v39 = vmax.f32 %v124_v33, 0.0 }
  0xbd   :  { %v125_v36 = vmax.f32 %v123_v34, 0.0 }
  0xbe   :  { %v138_v45 = vrot.slane %v126_v39, %v133_v35 }
  0xbf   :  { %v134_v40 = vrot.slane %v125_v36, %v133_v35 }
  0xc0   :  { %v144_v52 = vmul.f32 %v138_v45, %v128_v37  ;;  %v143_v53 = vmul.f32 %v138_v45, %v127_v38  ;;  %v146_v56 = vmul.f32 %v138_v45, %v130_v41  ;;  %v145_v57 = vmul.f32 %v138_v45, %v129_v42 }
  0xc1   :  { %v140_v43 = vmul.f32 %v134_v40, %v128_v37  ;;  %v139_v44 = vmul.f32 %v134_v40, %v127_v38  ;;  %v142_v48 = vmul.f32 %v134_v40, %v130_v41  ;;  %v141_v49 = vmul.f32 %v134_v40, %v129_v42 }
  0xc2   :  { %v162_v54 = vsel %vm95_vm0, %v144_v52, 0.0  ;;  %v159_v55 = vsel %vm95_vm0, %v143_v53, 0.0  ;;  %v168_v58 = vsel %vm95_vm0, %v146_v56, 0.0  ;;  %v165_v59 = vsel %vm95_vm0, %v145_v57, 0.0 }
  0xc3   :  { %v150_v46 = vsel %vm95_vm0, %v140_v43, 0.0  ;;  %v147_v47 = vsel %vm95_vm0, %v139_v44, 0.0  ;;  %v156_v50 = vsel %vm95_vm0, %v142_v48, 0.0  ;;  %v153_v51 = vsel %vm95_vm0, %v141_v49, 0.0 }
  0xc4   :  { %151 = vadd.xlane.f32.xlu1 %v150_v46  ;;  %148 = vadd.xlane.f32.xlu0 %v147_v47 }
  0xc8   :  { %157 = vadd.xlane.f32.xlu1 %v156_v50  ;;  %154 = vadd.xlane.f32.xlu0 %v153_v51 }
  0xcc   :  { %163 = vadd.xlane.f32.xlu1 %v162_v54  ;;  %160 = vadd.xlane.f32.xlu0 %v159_v55 }
  0xd0   :  { %169 = vadd.xlane.f32.xlu1 %v168_v58  ;;  %166 = vadd.xlane.f32.xlu0 %v165_v59 }
 0x14d   :  { %v152_v63 = vpop.xlane.xlu1 %151  ;;  %v149_v3 = vpop.xlane.xlu0 %148 }
 0x14e   :  { %v176_v7 = vadd.f32 %v172_v61, %v152_v63  ;;  %v175_v10 = vadd.f32 %v171_v62, %v149_v3 }
 0x150   :  { %v321_v17 = vmul.f32 -1.442695, %v176_v7  ;;  %v320_v22 = vmul.f32 -1.442695, %v175_v10 }
 0x151   :  { %v158_v23 = vpop.xlane.xlu1 %157  ;;  %v155_v24 = vpop.xlane.xlu0 %154 }
 0x152   :  { %335 = vpow2.f32 %v321_v17  ;;  %v178_v25 = vadd.f32 %v174_v11, %v158_v23  ;;  %v177_v26 = vadd.f32 %v173_v16, %v155_v24 }
 0x153   :  { %337 = vpow2.f32 %v320_v22 }
 0x154   :  { %v323_v27 = vmul.f32 -1.442695, %v178_v25  ;;  %v322_v28 = vmul.f32 -1.442695, %v177_v26 }
 0x155   :  { %v164_v29 = vpop.xlane.xlu1 %163  ;;  %v161_v30 = vpop.xlane.xlu0 %160 }
 0x156   :  { %339 = vpow2.f32 %v323_v27  ;;  %v179_v31 = vadd.f32 %v171_v62, %v161_v30  ;;  %v180_v32 = vadd.f32 %v172_v61, %v164_v29 }
 0x157   :  { %341 = vpow2.f32 %v322_v28 }
 0x158   :  { %v324_v33 = vmul.f32 -1.442695, %v179_v31  ;;  %v325_v36 = vmul.f32 -1.442695, %v180_v32 }
 0x159   :  { %v167_v34 = vpop.xlane.xlu0 %166  ;;  %v170_v37 = vpop.xlane.xlu1 %169 }
 0x15a   :  { %v181_v35 = vadd.f32 %v173_v16, %v167_v34  ;;  %343 = vpow2.f32 %v324_v33  ;;  %v182_v39 = vadd.f32 %v174_v11, %v170_v37 }
 0x15b   :  { %345 = vpow2.f32 %v325_v36 }
 0x15c   :  { %v326_v38 = vmul.f32 -1.442695, %v181_v35  ;;  %v327_v44 = vmul.f32 -1.442695, %v182_v39 }
 0x15e   :  { %347 = vpow2.f32 %v326_v38 }
 0x15f   :  { %v336_v40 = vpop.eup %335 }
 0x160   :  { %v338_v41 = vpop.eup %337  ;;  %v208_v42 = vadd.f32 1.0, %v336_v40 }
 0x161   :  { %v207_v43 = vadd.f32 1.0, %v338_v41 }
 0x162   :  { %349 = vrcp.f32 %v208_v42 }
 0x163   :  { %v340_v45 = vpop.eup %339  ;;  %351 = vrcp.f32 %v207_v43 }
 0x164   :  { %v342_v46 = vpop.eup %341  ;;  %353 = vpow2.f32 %v327_v44  ;;  %v210_v48 = vadd.f32 1.0, %v340_v45 }
 0x165   :  { %v209_v47 = vadd.f32 1.0, %v342_v46 }
 0x167   :  { %355 = vrcp.f32 %v209_v47  ;;  %v344_v49 = vpop.eup %343 }
 0x168   :  { %357 = vrcp.f32 %v210_v48  ;;  %v211_v50 = vadd.f32 1.0, %v344_v49  ;;  %v346_v51 = vpop.eup %345 }
 0x169   :  { %v212_v54 = vadd.f32 1.0, %v346_v51 }
 0x16a   :  { %359 = vrcp.f32 %v211_v50 }
 0x16b   :  { %v348_v52 = vpop.eup %347  ;;  %361 = vrcp.f32 %v212_v54 }
 0x16c   :  { %v213_v57 = vadd.f32 1.0, %v348_v52 }
 0x16e   :  { %363 = vrcp.f32 %v213_v57 }
 0x16f   :  { %v350_v53 = vpop.eup %349 }
 0x170   :  { %v352_v55 = vpop.eup %351  ;;  %238 = vperm.xlu1 %334, %v350_v53  }
 0x171   :  { %233 = vperm.xlu0 %333, %v352_v55   ;;  %v354_v56 = vpop.eup %353 }
 0x172   :  { %v214_v59 = vadd.f32 1.0, %v354_v56 }
 0x174   :  { %v356_v58 = vpop.eup %355  ;;  %365 = vrcp.f32 %v214_v59 }
 0x175   :  { %243 = vperm.xlu1 %334, %v356_v58   ;;  %v358_v60 = vpop.eup %357 }
 0x177   :  { %v360_v61 = vpop.eup %359 }
 0x178   :  { %v362_v62 = vpop.eup %361 }
 0x179   :  { %248 = vperm.xlu1 %334, %v358_v60  }
 0x17b   :  { %v364_v63 = vpop.eup %363 }
 0x17d   :  { %253 = vperm.xlu1 %334, %v360_v61  }
 0x181   :  { %258 = vperm.xlu1 %334, %v362_v62   ;;  %v366_v3 = vpop.eup %365 }
 0x185   :  { %263 = vperm.xlu1 %334, %v364_v63  }
 0x189   :  { %268 = vperm.xlu1 %334, %v366_v3  }
 0x1eb   :  { %v239_v7 = vpop.permute.xlu1 %238 }
 0x1ec   :  { %v273_v10 = vmul.f32 %v239_v7, %v468_v8  ;;  %v274_v11 = vmul.f32 %v239_v7, %v470_v9  ;;  %v234_v16 = vpop.permute.xlu0 %233 }
 0x1ed   :  { %v271_v17 = vmul.f32 %v234_v16, %v456_v2  ;;  %v272_v22 = vmul.f32 %v234_v16, %v460_v4 }
 0x1ee   :  { %289 = vst [vmem:[#allocation5 + $0x10] sm:$0xff] %v273_v10  ;;  %290 = vst [vmem:[#allocation5 + $0x18] sm:$0xff] %v274_v11 }
 0x1ef   :  { %287 = vst [vmem:[#allocation5] sm:$0xff] %v271_v17  ;;  %288 = vst [vmem:[#allocation5 + $0x8] sm:$0xff] %v272_v22 }
 0x1f0   :  { %v244_v23 = vpop.permute.xlu1 %243 }
 0x1f1   :  { %v275_v24 = vmul.f32 %v244_v23, %v480_v14  ;;  %v276_v25 = vmul.f32 %v244_v23, %v482_v15 }
 0x1f3   :  { %291 = vst [vmem:[#allocation5 + $0x20] sm:$0xff] %v275_v24  ;;  %292 = vst [vmem:[#allocation5 + $0x28] sm:$0xff] %v276_v25 }
 0x1f4   :  { %v249_v26 = vpop.permute.xlu1 %248 }
 0x1f5   :  { %v277_v8 = vmul.f32 %v249_v26, %v492_v20  ;;  %v278_v9 = vmul.f32 %v249_v26, %v494_v21 }
 0x1f7   :  { %293 = vst [vmem:[#allocation5 + $0x30] sm:$0xff] %v277_v8  ;;  %294 = vst [vmem:[#allocation5 + $0x38] sm:$0xff] %v278_v9 }
 0x1f8   :  { %v254_v2 = vpop.permute.xlu1 %253 }
 0x1f9   :  { %v279_v4 = vmul.f32 %v254_v2, %v452_v0  ;;  %v280_v27 = vmul.f32 %v254_v2, %v454_v1 }
 0x1fb   :  { %295 = vst [vmem:[#allocation5 + $0x40] sm:$0xff] %v279_v4  ;;  %296 = vst [vmem:[#allocation5 + $0x48] sm:$0xff] %v280_v27 }
 0x1fc   :  { %v259_v28 = vpop.permute.xlu1 %258 }
 0x1fd   :  { %v281_v14 = vmul.f32 %v259_v28, %v462_v5  ;;  %v282_v15 = vmul.f32 %v259_v28, %v464_v6 }
 0x1ff   :  { %297 = vst [vmem:[#allocation5 + $0x50] sm:$0xff] %v281_v14  ;;  %298 = vst [vmem:[#allocation5 + $0x58] sm:$0xff] %v282_v15 }
 0x200   :  { %v264_v29 = vpop.permute.xlu1 %263 }
 0x201   :  { %v283_v20 = vmul.f32 %v264_v29, %v476_v12  ;;  %v284_v21 = vmul.f32 %v264_v29, %v478_v13 }
 0x203   :  { %299 = vst [vmem:[#allocation5 + $0x60] sm:$0xff] %v283_v20  ;;  %300 = vst [vmem:[#allocation5 + $0x68] sm:$0xff] %v284_v21 }
 0x204   :  { %v269_v0 = vpop.permute.xlu1 %268 }
 0x205   :  { %v285_v1 = vmul.f32 %v269_v0, %v488_v18  ;;  %v286_v30 = vmul.f32 %v269_v0, %v490_v19 }
 0x207   :  { %301 = vst [vmem:[#allocation5 + $0x70] sm:$0xff] %v285_v1  ;;  %302 = vst [vmem:[#allocation5 + $0x78] sm:$0xff] %v286_v30 }
 0x208   :  { %398 = shalt.err (!%p395_p9)
}
 0x209   :  { %314 = dma.vmem_to_hbm [thread:$0]  %s309_s24, 2048, %s582_s5, [#allocation4], %s412_s21, %s412_s21, %s413_s22  }
 0x20a   :  { %409 = dma.done.wait [#allocation4], 2048  }
 0x20b   :  { %410 = vsyncadd [#allocation4], 4294965248 }
 0x20c   :  { %318 = vsyncpa [#allocation3], 1 }
 0x20d   :  { %319 = vsyncpa [#allocation4], 1 }

</bundles_post_ra>
